<compile_context>
chip_gen: v5e
topology: v5e:2x2
jax: 0.10.0
libtpu: 0.0.40
codegen_flags: <defaults>
</compile_context>

<pallas_src>
import math

import jax
import jax.numpy as jnp
from jax.experimental import pallas as pl
from jax.experimental.pallas import tpu as pltpu

HIDDEN = 1024  # l2 output width from the PyTorch module


def _sigmoid_one_eup(h):
    # sigmoid(h) == 0.5 * tanh(0.5 * h) + 0.5 : one transcendental per element.
    return 0.5 * jnp.tanh(0.5 * h) + 0.5


def gamma_kernel(scal_ref, t_ref, w_ref, out_ref):
    # scal_ref: SMEM (8,)   [softplus(w1), b1, b3, gamma_0, gamma_1, 0, 0, 0]
    # t_ref:    VMEM (tb, 1)  block of times
    # w_ref:    VMEM (8, H)   rows: 0 = softplus(l2 w), 1 = softplus(l3 w), 2 = l2 bias
    # out_ref:  VMEM (tb, 1)  gamma(t)
    sp_w1 = scal_ref[0]
    b1 = scal_ref[1]
    b3 = scal_ref[2]
    g0 = scal_ref[3]
    g1 = scal_ref[4]

    sp_w2 = w_ref[0:1, :]        # (1, H)
    sp_w3 = w_ref[1:2, :]        # (1, H)
    b2 = w_ref[2:3, :]           # (1, H)

    def gamma_tilde(x):
        # x: (rows, 1)
        l1 = x * sp_w1 + b1                                       # (rows, 1)
        h = l1 * sp_w2 + b2                                       # (rows, H)
        s = _sigmoid_one_eup(h)                                   # (rows, H)
        # PositiveLinear(H -> 1): VPU multiply + XLU lane reduction.  (MXU dot
        # would be free filler at large B; kept off the critical path at tiny B.)
        l3 = jnp.sum(s * sp_w3, axis=-1, keepdims=True) + b3      # (rows, 1)
        return l1 + l3

    # Endpoints t=0, t=1 built in-kernel as their own sublane-aligned (2, .)
    # pass — no wrapper-side concatenate, no cross-tile slicing of the batch.
    t_ep = jax.lax.broadcasted_iota(jnp.int32, (2, 1), 0).astype(jnp.float32)
    gt_ep = gamma_tilde(t_ep)                                     # (2, 1)
    gt_0 = gt_ep[0:1, :]                                          # (1, 1)
    gt_1 = gt_ep[1:2, :]                                          # (1, 1)

    gt_t = gamma_tilde(t_ref[...])                                # (tb, 1)

    inv = 1.0 / (gt_1 - gt_0)                                     # exact, once
    normalized = (gt_t - gt_0) * inv
    # gamma_0 + (gamma_1 - gamma_0) * normalized, vector-scalar ops only.
    out_ref[...] = (1.0 - normalized) * g0 + normalized * g1


def gamma_network(t, packed, *, block_b=512):
    """t: [B, 1] f32 -> gamma(t): [B, 1] f32."""
    scal, w_packed = packed
    B = t.shape[0]
    t32 = t.astype(jnp.float32).reshape(B, 1)

    # Block the batch axis (parallel grid) once B exceeds one block; keep the
    # second-last block dim a multiple of 8 (or the full extent) per the
    # (8, 128) layout rule.
    tb = B if B <= block_b else block_b
    if tb != B and tb % 8 != 0:
        tb = max(8, (tb // 8) * 8)
    nb = pl.cdiv(B, tb)
    Bp = nb * tb
    if Bp != B:
        t32 = jnp.pad(t32, ((0, Bp - B), (0, 0)))

    out = pl.pallas_call(
        gamma_kernel,
        out_shape=jax.ShapeDtypeStruct((Bp, 1), jnp.float32),
        grid=(nb,),
        in_specs=[
            pl.BlockSpec(memory_space=pltpu.MemorySpace.SMEM),   # scalars (8,)
            pl.BlockSpec((tb, 1), lambda i: (i, 0)),             # t block
            pl.BlockSpec((8, HIDDEN), lambda i: (0, 0)),         # packed weights
        ],
        out_specs=pl.BlockSpec((tb, 1), lambda i: (i, 0)),
        compiler_params=pltpu.CompilerParams(
            dimension_semantics=("parallel",)),
    )(scal, t32, w_packed)

    return out[:B] if Bp != B else out


def init_raw_params(key):
    """Deterministic synthetic init mimicking PositiveLinear.reset_parameters."""
    ks = jax.random.split(key, 6)
    offset = -2.0

    # l1: weight (1,1), bias (1,)    fan_in = 1 -> bound = 1
    w1 = jax.random.uniform(ks[0], (1, 1), minval=-1.0, maxval=1.0) + offset
    b1 = jax.random.uniform(ks[1], (1,), minval=-1.0, maxval=1.0)

    # l2: weight (H,1), bias (H,)    fan_in = 1 -> bound = 1
    w2 = jax.random.uniform(ks[2], (HIDDEN, 1), minval=-1.0, maxval=1.0) + offset
    b2 = jax.random.uniform(ks[3], (HIDDEN,), minval=-1.0, maxval=1.0)

    # l3: weight (1,H), bias (1,)    fan_in = H -> bound = 1/sqrt(H)
    bnd = 1.0 / math.sqrt(HIDDEN)
    w3 = jax.random.uniform(ks[4], (1, HIDDEN), minval=-bnd, maxval=bnd) + offset
    b3 = jax.random.uniform(ks[5], (1,), minval=-bnd, maxval=bnd)

    return dict(
        w1=w1.astype(jnp.float32), b1=b1.astype(jnp.float32),
        w2=w2.astype(jnp.float32), b2=b2.astype(jnp.float32),
        w3=w3.astype(jnp.float32), b3=b3.astype(jnp.float32),
        gamma_0=jnp.float32(-5.0), gamma_1=jnp.float32(10.0))


def pack_params(raw):
    """One-time transform: softplus(weights) hoisted out of the per-call kernel
    (forward-pass / frozen-param use; for training the softplus must move back
    into the kernel so gradients reach the raw weights)."""
    sp = jax.nn.softplus

    scal = jnp.zeros((8,), jnp.float32)
    scal = scal.at[0].set(sp(raw["w1"][0, 0]))
    scal = scal.at[1].set(raw["b1"][0])
    scal = scal.at[2].set(raw["b3"][0])
    scal = scal.at[3].set(raw["gamma_0"])
    scal = scal.at[4].set(raw["gamma_1"])

    # Lane-dense (8, H) slab: row 0 = softplus(l2 weight) (stored as a row:
    # in=1 -> out=H), row 1 = softplus(l3 weight), row 2 = l2 bias, rest pad.
    w_packed = jnp.zeros((8, HIDDEN), jnp.float32)
    w_packed = w_packed.at[0, :].set(sp(raw["w2"].reshape(HIDDEN)))
    w_packed = w_packed.at[1, :].set(sp(raw["w3"].reshape(HIDDEN)))
    w_packed = w_packed.at[2, :].set(raw["b2"].reshape(HIDDEN))

    return scal.astype(jnp.float32), w_packed.astype(jnp.float32)


def gamma_network_ref(t, raw):
    """Pure-JAX reference of GammaNetwork.forward (softplus applied per call)."""
    sp = jax.nn.softplus
    w1, b1 = raw["w1"][0, 0], raw["b1"][0]
    w2 = raw["w2"].reshape(1, HIDDEN)
    b2 = raw["b2"].reshape(1, HIDDEN)
    w3 = raw["w3"].reshape(1, HIDDEN)
    b3 = raw["b3"][0]
    g0, g1 = raw["gamma_0"], raw["gamma_1"]

    def gamma_tilde(x):
        l1 = x * sp(w1) + b1
        h = l1 * sp(w2) + b2
        l3 = jnp.sum(jax.nn.sigmoid(h) * sp(w3), axis=-1, keepdims=True) + b3
        return l1 + l3

    gt_t = gamma_tilde(t)
    gt_0 = gamma_tilde(jnp.zeros_like(t))
    gt_1 = gamma_tilde(jnp.ones_like(t))
    normalized = (gt_t - gt_0) / (gt_1 - gt_0)
    return g0 + (g1 - g0) * normalized


if __name__ == "__main__":
    key = jax.random.PRNGKey(0)
    pkey, tkey = jax.random.split(key)

    raw = init_raw_params(pkey)
    packed = pack_params(raw)

    B = 8
    t = jax.random.uniform(tkey, (B, 1), dtype=jnp.float32)  # times in [0, 1)

    out = gamma_network(t, packed)
    out = jax.block_until_ready(out)

    ref = gamma_network_ref(t, raw)
    assert out.shape == (B, 1)
    assert jnp.allclose(out, ref, atol=1e-4, rtol=1e-4), (out, ref)

    print("KERNEL_OK")
</pallas_src>

<mosaic_0001>
module attributes {stable_mosaic.version = 11 : i64} {
  func.func @gamma_kernel(%arg0: i32, %arg1: memref<8xf32, #tpu.memory_space<smem>>, %arg2: memref<8x1xf32, #tpu.memory_space<vmem>>, %arg3: memref<8x1024xf32, #tpu.memory_space<vmem>>, %arg4: memref<8x1xf32, #tpu.memory_space<vmem>>) attributes {dimension_semantics = [#tpu.dimension_semantics<parallel>], iteration_bounds = array<i64: 1>, scalar_prefetch = 0 : i64, scratch_operands = 0 : i64, tpu.core_type = #tpu.core_type<tc>, window_params = [{transform_indices = @transform_0, window_bounds = array<i64: 8>}, {transform_indices = @transform_1, window_bounds = array<i64: 8, 1>}, {pipeline_mode = #tpu.pipeline_mode<synchronous>, transform_indices = @transform_2, window_bounds = array<i64: 8, 1024>}, {transform_indices = @transform_3, window_bounds = array<i64: 8, 1>}]} {
    %c0 = arith.constant 0 : index
    %0 = memref.load %arg1[%c0] : memref<8xf32, #tpu.memory_space<smem>>
    %c1 = arith.constant 1 : index
    %1 = memref.load %arg1[%c1] : memref<8xf32, #tpu.memory_space<smem>>
    %c2 = arith.constant 2 : index
    %2 = memref.load %arg1[%c2] : memref<8xf32, #tpu.memory_space<smem>>
    %c3 = arith.constant 3 : index
    %3 = memref.load %arg1[%c3] : memref<8xf32, #tpu.memory_space<smem>>
    %c4 = arith.constant 4 : index
    %4 = memref.load %arg1[%c4] : memref<8xf32, #tpu.memory_space<smem>>
    %c0_0 = arith.constant 0 : index
    %c0_1 = arith.constant 0 : index
    %5 = vector.load %arg3[%c0_0, %c0_1] : memref<8x1024xf32, #tpu.memory_space<vmem>>, vector<1x1024xf32>
    %c1_2 = arith.constant 1 : index
    %c0_3 = arith.constant 0 : index
    %6 = vector.load %arg3[%c1_2, %c0_3] : memref<8x1024xf32, #tpu.memory_space<vmem>>, vector<1x1024xf32>
    %c2_4 = arith.constant 2 : index
    %c0_5 = arith.constant 0 : index
    %7 = vector.load %arg3[%c2_4, %c0_5] : memref<8x1024xf32, #tpu.memory_space<vmem>>, vector<1x1024xf32>
    %8 = tpu.iota {dimensions = array<i32: 0>} : vector<2x1xi32>
    %9 = arith.sitofp %8 : vector<2x1xi32> to vector<2x1xf32>
    %10 = vector.broadcast %0 : f32 to vector<2x1xf32>
    %11 = arith.mulf %9, %10 : vector<2x1xf32>
    %12 = vector.broadcast %1 : f32 to vector<2x1xf32>
    %13 = arith.addf %11, %12 : vector<2x1xf32>
    %14 = vector.broadcast %13 : vector<2x1xf32> to vector<2x1024xf32>
    %15 = vector.broadcast %5 : vector<1x1024xf32> to vector<2x1024xf32>
    %16 = arith.mulf %14, %15 : vector<2x1024xf32>
    %17 = vector.broadcast %7 : vector<1x1024xf32> to vector<2x1024xf32>
    %18 = arith.addf %16, %17 : vector<2x1024xf32>
    %cst = arith.constant 5.000000e-01 : f32
    %19 = vector.broadcast %cst : f32 to vector<2x1024xf32>
    %20 = arith.mulf %19, %18 : vector<2x1024xf32>
    %21 = math.tanh %20 : vector<2x1024xf32>
    %cst_6 = arith.constant 5.000000e-01 : f32
    %22 = vector.broadcast %cst_6 : f32 to vector<2x1024xf32>
    %23 = arith.mulf %22, %21 : vector<2x1024xf32>
    %cst_7 = arith.constant 5.000000e-01 : f32
    %24 = vector.broadcast %cst_7 : f32 to vector<2x1024xf32>
    %25 = arith.addf %23, %24 : vector<2x1024xf32>
    %26 = vector.broadcast %6 : vector<1x1024xf32> to vector<2x1024xf32>
    %27 = arith.mulf %25, %26 : vector<2x1024xf32>
    %cst_8 = arith.constant dense<0.000000e+00> : vector<2xf32>
    %28 = vector.multi_reduction <add>, %27, %cst_8 [1] : vector<2x1024xf32> to vector<2xf32>
    %29 = vector.shape_cast %28 : vector<2xf32> to vector<2x1xf32>
    %30 = vector.broadcast %2 : f32 to vector<2x1xf32>
    %31 = arith.addf %29, %30 : vector<2x1xf32>
    %32 = arith.addf %13, %31 : vector<2x1xf32>
    %33 = vector.extract_strided_slice %32 {offsets = [0, 0], sizes = [1, 1], strides = [1, 1]} : vector<2x1xf32> to vector<1x1xf32>
    %34 = vector.extract_strided_slice %32 {offsets = [1, 0], sizes = [1, 1], strides = [1, 1]} : vector<2x1xf32> to vector<1x1xf32>
    %c0_9 = arith.constant 0 : index
    %c0_10 = arith.constant 0 : index
    %35 = vector.load %arg2[%c0_9, %c0_10] : memref<8x1xf32, #tpu.memory_space<vmem>>, vector<8x1xf32>
    %36 = vector.broadcast %0 : f32 to vector<8x1xf32>
    %37 = arith.mulf %35, %36 : vector<8x1xf32>
    %38 = vector.broadcast %1 : f32 to vector<8x1xf32>
    %39 = arith.addf %37, %38 : vector<8x1xf32>
    %40 = vector.broadcast %39 : vector<8x1xf32> to vector<8x1024xf32>
    %41 = vector.broadcast %5 : vector<1x1024xf32> to vector<8x1024xf32>
    %42 = arith.mulf %40, %41 : vector<8x1024xf32>
    %43 = vector.broadcast %7 : vector<1x1024xf32> to vector<8x1024xf32>
    %44 = arith.addf %42, %43 : vector<8x1024xf32>
    %cst_11 = arith.constant 5.000000e-01 : f32
    %45 = vector.broadcast %cst_11 : f32 to vector<8x1024xf32>
    %46 = arith.mulf %45, %44 : vector<8x1024xf32>
    %47 = math.tanh %46 : vector<8x1024xf32>
    %cst_12 = arith.constant 5.000000e-01 : f32
    %48 = vector.broadcast %cst_12 : f32 to vector<8x1024xf32>
    %49 = arith.mulf %48, %47 : vector<8x1024xf32>
    %cst_13 = arith.constant 5.000000e-01 : f32
    %50 = vector.broadcast %cst_13 : f32 to vector<8x1024xf32>
    %51 = arith.addf %49, %50 : vector<8x1024xf32>
    %52 = vector.broadcast %6 : vector<1x1024xf32> to vector<8x1024xf32>
    %53 = arith.mulf %51, %52 : vector<8x1024xf32>
    %cst_14 = arith.constant dense<0.000000e+00> : vector<8xf32>
    %54 = vector.multi_reduction <add>, %53, %cst_14 [1] : vector<8x1024xf32> to vector<8xf32>
    %55 = vector.shape_cast %54 : vector<8xf32> to vector<8x1xf32>
    %56 = vector.broadcast %2 : f32 to vector<8x1xf32>
    %57 = arith.addf %55, %56 : vector<8x1xf32>
    %58 = arith.addf %39, %57 : vector<8x1xf32>
    %59 = arith.subf %34, %33 : vector<1x1xf32>
    %cst_15 = arith.constant 1.000000e+00 : f32
    %60 = vector.broadcast %cst_15 : f32 to vector<1x1xf32>
    %61 = arith.divf %60, %59 : vector<1x1xf32>
    %62 = vector.broadcast %33 : vector<1x1xf32> to vector<8x1xf32>
    %63 = arith.subf %58, %62 : vector<8x1xf32>
    %64 = vector.broadcast %61 : vector<1x1xf32> to vector<8x1xf32>
    %65 = arith.mulf %63, %64 : vector<8x1xf32>
    %cst_16 = arith.constant 1.000000e+00 : f32
    %66 = vector.broadcast %cst_16 : f32 to vector<8x1xf32>
    %67 = arith.subf %66, %65 : vector<8x1xf32>
    %68 = vector.broadcast %3 : f32 to vector<8x1xf32>
    %69 = arith.mulf %67, %68 : vector<8x1xf32>
    %70 = vector.broadcast %4 : f32 to vector<8x1xf32>
    %71 = arith.mulf %65, %70 : vector<8x1xf32>
    %72 = arith.addf %69, %71 : vector<8x1xf32>
    %c0_17 = arith.constant 0 : index
    %c0_18 = arith.constant 0 : index
    %73 = vector.load %arg4[%c0_17, %c0_18] : memref<8x1xf32, #tpu.memory_space<vmem>>, vector<8x1xf32>
    tpu.vector_store %arg4[%c0_17, %c0_18], %72 {strides = array<i32>} : memref<8x1xf32, #tpu.memory_space<vmem>>, vector<8x1xf32>,
    return
  }
  func.func @transform_0(%arg0: i32) -> i32 {
    %c0_i32 = arith.constant 0 : i32
    %c0_i32_0 = arith.constant 0 : i32
    return %c0_i32 : i32
  }
  func.func @transform_1(%arg0: i32) -> (i32, i32) {
    %c0_i32 = arith.constant 0 : i32
    %c0_i32_0 = arith.constant 0 : i32
    return %arg0, %c0_i32 : i32, i32
  }
  func.func @transform_2(%arg0: i32) -> (i32, i32) {
    %c0_i32 = arith.constant 0 : i32
    %c0_i32_0 = arith.constant 0 : i32
    %c0_i32_1 = arith.constant 0 : i32
    return %c0_i32, %c0_i32_0 : i32, i32
  }
  func.func @transform_3(%arg0: i32) -> (i32, i32) {
    %c0_i32 = arith.constant 0 : i32
    %c0_i32_0 = arith.constant 0 : i32
    return %arg0, %c0_i32 : i32, i32
  }
}

</mosaic_0001>

<bundles_post_ra>
// kernel: tpu_custom_call.1
= control target key start
LH: loop header
LB: loop body
LE: loop exit
PB: predicated region body
PF: predicated region fallthrough
CT: control target
= control target key end

     0   :  { %8 = vsyncpa [#allocation4], 0  ;;  %s570_s0 = inlined_call_operand.vmem [shape: f32[8], index: 0, kind: input, shape index: {}]   ;;  %s571_s1 = inlined_call_operand.vmem [shape: f32[8,1], index: 1, kind: input, shape index: {}]   ;;  %s572_s2 = inlined_call_operand.hbm [shape: f32[8,1024], index: 2, kind: input, shape index: {}]   ;;  %s573_s3 = inlined_call_operand.vmem [shape: f32[8,1], index: 3, kind: output, shape index: {}]  }
   0x1   :  { %s15_s14 = sshll.u32 %s570_s0, 4  ;;  %s16_s14 = int_to_ptr.vmem [resolvable:$true] %s15_s14 }
   0x2   :  { %9 = vsyncpa [#allocation3], 0  ;;  %s26_s17 = sshll.u32 %s572_s2, 4  ;;  %s386_s18 = smov [#allocation2]   ;;  %s27_s17 = int_to_ptr.hbm [resolvable:$true] %s26_s17 }
   0x3   :  { %18 = dma.vmem_to_smem %s16_s14, 16, %s386_s18, [#allocation4]  }
   0x4   :  { %s387_s19 = smov [#allocation5]  }
   0x5   :  { %s28_s20 = sshll.u32 %s387_s19, 4  ;;  %s29_s20 = int_to_ptr.vmem [resolvable:$true] %s28_s20 }
   0x6   :  { %31 = dma.hbm_to_vmem [thread:$0]  %s27_s17, 1024, %s29_s20, [#allocation3]  }
   0x7   :  { %382 = dma.done.wait [#allocation4], 16  }
   0x8   :  { %383 = vsyncadd [#allocation4], 4294967280 }
   0x9   :  { %384 = dma.done.wait [#allocation3], 1024  }
   0xa   :  { %385 = vsyncadd [#allocation3], 4294966272 }
   0xb   :  { %40 = sfence }
   0xc   :  { %s41_s21 = sld [smem:[#allocation2]]  ;;  %v57_v0 = vlaneseq  ;;  %v388_v1 = vmov 0   ;;  %v46_v2 = vld [vmem:[#allocation5] ss:$8 sm:$0xf]  ;;  %vm171_vm0 = vcmask 1041408  }
   0xd   :  { %311 = vset.pattern.permute.xlu0 %v388_v1  ;;  %s304_s0 = sld [smem:[#allocation2 + $0x1]]  ;;  %v47_v4 = vld [vmem:[#allocation5] ss:$8 sm:$0xf0]  ;;  %vm296_vm5 = vcmask 7168  }
   0xe   :  { %v58_v3 = vshrl.u32 %v57_v0, 7  ;;  %v192_v5 = vld [vmem:[%s571_s1] sm:$0xff]  ;;  %v418_v6 = vor.u32 %v47_v4, %v46_v2  ;;  %s305_s1 = sld [smem:[#allocation2 + $0x2]] }
   0xf   :  { %v54_v8 = vld [vmem:[#allocation5 + $0x2] ss:$8 sm:$0xf]  ;;  %v50_v51 = vld [vmem:[#allocation5 + $0x1] ss:$8 sm:$0xf] }
  0x10   :  { %v59_v7 = vcvt.s32.f32 %v58_v3  ;;  %v55_v9 = vld [vmem:[#allocation5 + $0x2] ss:$8 sm:$0xf0]  ;;  %v65_v11 = vperm.slane %v418_v6, 0  ;;  %v66_v12 = vperm.slane %v418_v6, 1  ;;  %v67_v14 = vperm.slane %v418_v6, 2 }
  0x11   :  { %v420_v10 = vor.u32 %v55_v9, %v54_v8  ;;  %v68_v15 = vperm.slane %v418_v6, 3  ;;  %v69_v16 = vperm.slane %v418_v6, 4  ;;  %v70_v20 = vperm.slane %v418_v6, 5  ;;  %v51_v53 = vld [vmem:[#allocation5 + $0x1] ss:$8 sm:$0xf0] }
  0x12   :  { %v60_v13 = vstv %s41_s21  ;;  %v71_v21 = vperm.slane %v418_v6, 6  ;;  %v72_v22 = vperm.slane %v418_v6, 7  ;;  %v483_v58 = vor.u32 %v51_v53, %v50_v51  ;;  %s306_s23 = sld [smem:[#allocation2 + $0x3]] }
  0x13   :  { %v62_v17 = vstv %s304_s0  ;;  %v193_v18 = vmul.f32 %v192_v5, %v60_v13  ;;  %v61_v19 = vmul.f32 %v60_v13, %v59_v7  ;;  %v90_v23 = vperm.slane %v420_v10, 0  ;;  %s307_s24 = sld [smem:[#allocation2 + $0x4]] }
  0x14   :  { %v91_v24 = vperm.slane %v420_v10, 1  ;;  %v92_v27 = vperm.slane %v420_v10, 2  ;;  %v93_v28 = vperm.slane %v420_v10, 3  ;;  %v94_v29 = vperm.slane %v420_v10, 4 }
  0x15   :  { %v432_v25 = vadd.f32 %v193_v18, %v62_v17  ;;  %v434_v26 = vadd.f32 %v62_v17, %v61_v19  ;;  %v95_v30 = vperm.slane %v420_v10, 5  ;;  %v96_v31 = vperm.slane %v420_v10, 6 }
  0x16   :  { %v97_v32 = vperm.slane %v420_v10, 7  ;;  %v147_v63 = vperm.slane %v483_v58, 0  ;;  %v148_v2 = vperm.slane %v483_v58, 1  ;;  %v149_v7 = vperm.slane %v483_v58, 2 }
  0x17   :  { %197 = vperm.xlu0 %311, %v432_v25   ;;  %v81_v33 = vmul.f32 %v65_v11, %v434_v26  ;;  %v82_v34 = vmul.f32 %v66_v12, %v434_v26  ;;  %v83_v35 = vmul.f32 %v67_v14, %v434_v26  ;;  %v84_v36 = vmul.f32 %v68_v15, %v434_v26 }
  0x18   :  { %v85_v37 = vmul.f32 %v69_v16, %v434_v26  ;;  %v86_v38 = vmul.f32 %v70_v20, %v434_v26  ;;  %v87_v39 = vmul.f32 %v71_v21, %v434_v26  ;;  %v88_v40 = vmul.f32 %v72_v22, %v434_v26 }
  0x19   :  { %v106_v41 = vadd.f32 %v90_v23, %v81_v33  ;;  %v107_v42 = vadd.f32 %v91_v24, %v82_v34  ;;  %v108_v43 = vadd.f32 %v92_v27, %v83_v35  ;;  %v109_v44 = vadd.f32 %v93_v28, %v84_v36 }
  0x1a   :  { %v110_v45 = vadd.f32 %v94_v29, %v85_v37  ;;  %v111_v46 = vadd.f32 %v95_v30, %v86_v38  ;;  %v112_v47 = vadd.f32 %v96_v31, %v87_v39  ;;  %v113_v54 = vadd.f32 %v97_v32, %v88_v40 }
  0x1b   :  { %v114_v48 = vmul.f32 0.5, %v106_v41  ;;  %v115_v49 = vmul.f32 0.5, %v107_v42  ;;  %v116_v50 = vmul.f32 0.5, %v108_v43  ;;  %v117_v52 = vmul.f32 0.5, %v109_v44 }
  0x1c   :  { %v118_v55 = vmul.f32 0.5, %v110_v45  ;;  %v119_v56 = vmul.f32 0.5, %v111_v46  ;;  %v120_v57 = vmul.f32 0.5, %v112_v47  ;;  %v121_v59 = vmul.f32 0.5, %v113_v54 }
  0x1d   :  { %312 = vtanh.f32 %v114_v48  ;;  %v150_v17 = vperm.slane %v483_v58, 3  ;;  %v151_v34 = vperm.slane %v483_v58, 4  ;;  %v152_v39 = vperm.slane %v483_v58, 5 }
  0x1e   :  { %314 = vtanh.f32 %v115_v49 }
  0x1f   :  { %316 = vtanh.f32 %v116_v50 }
  0x20   :  { %318 = vtanh.f32 %v117_v52  ;;  %v153_v52 = vperm.slane %v483_v58, 6 }
  0x21   :  { %320 = vtanh.f32 %v118_v55 }
  0x22   :  { %322 = vtanh.f32 %v119_v56 }
  0x23   :  { %v313_v60 = vpop.eup %312  ;;  %324 = vtanh.f32 %v120_v57 }
  0x24   :  { %v315_v61 = vpop.eup %314  ;;  %v130_v62 = vmul.f32 0.5, %v313_v60  ;;  %326 = vtanh.f32 %v121_v59 }
  0x25   :  { %v317_v0 = vpop.eup %316  ;;  %v131_v1 = vmul.f32 0.5, %v315_v61  ;;  %v154_v61 = vperm.slane %v483_v58, 7 }
  0x26   :  { %v319_v3 = vpop.eup %318  ;;  %v132_v4 = vmul.f32 0.5, %v317_v0  ;;  %v138_v5 = vadd.f32 0.5, %v130_v62 }
  0x27   :  { %v321_v8 = vpop.eup %320  ;;  %v133_v9 = vmul.f32 0.5, %v319_v3  ;;  %v139_v13 = vadd.f32 0.5, %v131_v1 }
  0x28   :  { %v323_v18 = vpop.eup %322  ;;  %v134_v19 = vmul.f32 0.5, %v321_v8  ;;  %v140_v33 = vadd.f32 0.5, %v132_v4  ;;  %v163_v35 = vmul.f32 %v147_v63, %v138_v5 }
  0x29   :  { %v325_v36 = vpop.eup %324  ;;  %v135_v37 = vmul.f32 0.5, %v323_v18  ;;  %v141_v38 = vadd.f32 0.5, %v133_v9  ;;  %v164_v40 = vmul.f32 %v148_v2, %v139_v13 }
  0x2a   :  { %v136_v41 = vmul.f32 0.5, %v325_v36  ;;  %v142_v42 = vadd.f32 0.5, %v134_v19  ;;  %v165_v43 = vmul.f32 %v149_v7, %v140_v33  ;;  %v172_v44 = vsel %vm171_vm0, %v163_v35, 0.0  ;;  %v327_v45 = vpop.eup %326 }
  0x2b   :  { %v143_v46 = vadd.f32 0.5, %v135_v37  ;;  %v166_v47 = vmul.f32 %v150_v17, %v141_v38  ;;  %v173_v48 = vsel %vm171_vm0, %v164_v40, 0.0  ;;  %v137_v54 = vmul.f32 0.5, %v327_v45 }
  0x2c   :  { %v167_v49 = vmul.f32 %v151_v34, %v142_v42  ;;  %v174_v50 = vadd.f32 %v173_v48, %v172_v44  ;;  %v175_v51 = vsel %vm171_vm0, %v165_v43, 0.0  ;;  %v144_v55 = vadd.f32 0.5, %v136_v41 }
  0x2d   :  { %v177_v53 = vsel %vm171_vm0, %v166_v47, 0.0  ;;  %v168_v56 = vmul.f32 %v152_v39, %v143_v46  ;;  %v145_v62 = vadd.f32 0.5, %v137_v54 }
  0x2e   :  { %v176_v57 = vadd.f32 %v175_v51, %v174_v50  ;;  %v179_v59 = vsel %vm171_vm0, %v167_v49, 0.0  ;;  %v169_v0 = vmul.f32 %v153_v52, %v144_v55 }
  0x2f   :  { %v181_v3 = vsel %vm171_vm0, %v168_v56, 0.0  ;;  %v170_v5 = vmul.f32 %v154_v61, %v145_v62 }
  0x30   :  { %v178_v60 = vadd.f32 %v177_v53, %v176_v57  ;;  %v183_v8 = vsel %vm171_vm0, %v169_v0, 0.0 }
  0x31   :  { %v185_v13 = vsel %vm171_vm0, %v170_v5, 0.0 }
  0x32   :  { %v180_v1 = vadd.f32 %v179_v59, %v178_v60 }
  0x34   :  { %v182_v4 = vadd.f32 %v181_v3, %v180_v1 }
  0x36   :  { %v184_v9 = vadd.f32 %v183_v8, %v182_v4 }
  0x38   :  { %v186_v18 = vadd.f32 %v185_v13, %v184_v9 }
  0x41   :  { %187 = vadd.xlane.f32.xlu0 %v186_v18 }
  0x89   :  { %v198_v19 = vpop.permute.xlu0 %197 }
  0x8a   :  { %v200_v33 = vmul.f32 %v198_v19, %v65_v11  ;;  %v201_v35 = vmul.f32 %v198_v19, %v66_v12  ;;  %v202_v36 = vmul.f32 %v198_v19, %v67_v14  ;;  %v203_v37 = vmul.f32 %v198_v19, %v68_v15 }
  0x8b   :  { %v204_v38 = vmul.f32 %v198_v19, %v69_v16  ;;  %v205_v40 = vmul.f32 %v198_v19, %v70_v20  ;;  %v206_v41 = vmul.f32 %v198_v19, %v71_v21  ;;  %v207_v11 = vmul.f32 %v198_v19, %v72_v22 }
  0x8c   :  { %v208_v12 = vadd.f32 %v200_v33, %v90_v23  ;;  %v209_v14 = vadd.f32 %v201_v35, %v91_v24  ;;  %v210_v15 = vadd.f32 %v202_v36, %v92_v27  ;;  %v211_v16 = vadd.f32 %v203_v37, %v93_v28 }
  0x8d   :  { %v212_v20 = vadd.f32 %v204_v38, %v94_v29  ;;  %v213_v21 = vadd.f32 %v205_v40, %v95_v30  ;;  %v214_v6 = vadd.f32 %v206_v41, %v96_v31  ;;  %v215_v24 = vadd.f32 %v207_v11, %v97_v32 }
  0x8e   :  { %v216_v22 = vmul.f32 0.5, %v208_v12  ;;  %v217_v23 = vmul.f32 0.5, %v209_v14  ;;  %v218_v42 = vmul.f32 0.5, %v210_v15  ;;  %v219_v43 = vmul.f32 0.5, %v211_v16 }
  0x8f   :  { %v220_v27 = vmul.f32 0.5, %v212_v20  ;;  %v221_v44 = vmul.f32 0.5, %v213_v21  ;;  %v222_v28 = vmul.f32 0.5, %v214_v6  ;;  %v223_v29 = vmul.f32 0.5, %v215_v24 }
  0x90   :  { %328 = vtanh.f32 %v216_v22  ;;  %v189_v41 = vstv %s305_s1 }
  0x91   :  { %330 = vtanh.f32 %v217_v23 }
  0x92   :  { %332 = vtanh.f32 %v218_v42 }
  0x93   :  { %334 = vtanh.f32 %v219_v43 }
  0x94   :  { %336 = vtanh.f32 %v220_v27 }
  0x95   :  { %338 = vtanh.f32 %v221_v44 }
  0x96   :  { %v329_v30 = vpop.eup %328  ;;  %340 = vtanh.f32 %v222_v28 }
  0x97   :  { %v331_v31 = vpop.eup %330  ;;  %342 = vtanh.f32 %v223_v29  ;;  %v232_v45 = vmul.f32 0.5, %v329_v30  ;;  %v291_v29 = vstv %s306_s23  ;;  %v293_v30 = vstv %s307_s24 }
  0x98   :  { %v333_v46 = vpop.eup %332  ;;  %v233_v47 = vmul.f32 0.5, %v331_v31 }
  0x99   :  { %v335_v10 = vpop.eup %334  ;;  %v234_v32 = vmul.f32 0.5, %v333_v46  ;;  %v240_v48 = vadd.f32 0.5, %v232_v45 }
  0x9a   :  { %v337_v49 = vpop.eup %336  ;;  %v235_v50 = vmul.f32 0.5, %v335_v10  ;;  %v241_v51 = vadd.f32 0.5, %v233_v47 }
  0x9b   :  { %v339_v53 = vpop.eup %338  ;;  %v236_v54 = vmul.f32 0.5, %v337_v49  ;;  %v242_v55 = vadd.f32 0.5, %v234_v32  ;;  %v248_v56 = vmul.f32 %v240_v48, %v147_v63 }
  0x9c   :  { %v341_v57 = vpop.eup %340  ;;  %v237_v59 = vmul.f32 0.5, %v339_v53  ;;  %v243_v60 = vadd.f32 0.5, %v235_v50  ;;  %v249_v62 = vmul.f32 %v241_v51, %v148_v2 }
  0x9d   :  { %v343_v0 = vpop.eup %342  ;;  %v238_v1 = vmul.f32 0.5, %v341_v57  ;;  %v244_v3 = vadd.f32 0.5, %v236_v54  ;;  %v250_v4 = vmul.f32 %v242_v55, %v149_v7 }
  0x9e   :  { %v256_v5 = vadd.f32 %v249_v62, %v248_v56  ;;  %v239_v8 = vmul.f32 0.5, %v343_v0  ;;  %v245_v9 = vadd.f32 0.5, %v237_v59  ;;  %v251_v13 = vmul.f32 %v243_v60, %v150_v17 }
  0x9f   :  { %v246_v63 = vadd.f32 0.5, %v238_v1  ;;  %v252_v19 = vmul.f32 %v244_v3, %v151_v34 }
  0xa0   :  { %v257_v18 = vadd.f32 %v256_v5, %v250_v4  ;;  %v247_v35 = vadd.f32 0.5, %v239_v8  ;;  %v253_v2 = vmul.f32 %v245_v9, %v152_v39 }
  0xa1   :  { %v254_v7 = vmul.f32 %v246_v63, %v153_v52 }
  0xa2   :  { %v258_v33 = vadd.f32 %v257_v18, %v251_v13  ;;  %v255_v38 = vmul.f32 %v247_v35, %v154_v61 }
  0xa4   :  { %v259_v36 = vadd.f32 %v258_v33, %v252_v19 }
  0xa6   :  { %v260_v37 = vadd.f32 %v259_v36, %v253_v2 }
  0xa8   :  { %v261_v40 = vadd.f32 %v260_v37, %v254_v7 }
  0xaa   :  { %v262_v17 = vadd.f32 %v261_v40, %v255_v38 }
  0xac   :  { %263 = vadd.xlane.f32.xlu1 %v262_v17 }
  0xb4   :  { %v188_v11 = vpop.xlane.xlu0 %187 }
  0xb5   :  { %v190_v34 = vadd.f32 %v189_v41, %v188_v11 }
  0xb7   :  { %v191_v12 = vadd.f32 %v190_v34, %v434_v26 }
  0xb9   :  { %v268_v14 = vrot.slane %v191_v12, 7  ;;  %v286_v43 = vperm.slane %v191_v12, 0 }
  0xbb   :  { %v270_v15 = vsub.f32 %v191_v12, %v268_v14 }
  0xbd   :  { %344 = vrcp.f32 %v270_v15  ;;  %vm276_vm1 = vweird.f32 %v270_v15  ;;  %v282_v58 = vand.u32 2147483648, %v270_v15  ;;  %v280_v21 = vand.u32 2147483647, %v270_v15 }
  0xbf   :  { %v283_v6 = vor.u32 1.1754944e-38, %v282_v58  ;;  %vm281_vm4 = vcmp.eq.f32.partialorder %v280_v21, 8.507059e+37 }
  0xc3   :  { %v345_v39 = vpop.eup %344 }
  0xc4   :  { %v272_v16 = vmul.f32 %v345_v39, %v270_v15  ;;  %vm277_vm2 = vweird.f32 %v345_v39 }
  0xc5   :  { %vm278_vm3 = vmor %vm276_vm1, %vm277_vm2 }
  0xc6   :  { %v273_v20 = vsub.f32 1.0, %v272_v16 }
  0xc8   :  { %v274_v52 = vmul.f32 %v345_v39, %v273_v20 }
  0xca   :  { %v275_v61 = vadd.f32 %v345_v39, %v274_v52 }
  0xcc   :  { %v279_v22 = vsel %vm278_vm3, %v345_v39, %v275_v61 }
  0xcd   :  { %v284_v42 = vsel %vm281_vm4, %v283_v6, %v279_v22 }
  0xce   :  { %v288_v44 = vperm.slane %v284_v42, 1 }
 0x11f   :  { %v264_v23 = vpop.xlane.xlu1 %263 }
 0x120   :  { %v265_v26 = vadd.f32 %v264_v23, %v189_v41 }
 0x122   :  { %v266_v24 = vadd.f32 %v265_v26, %v432_v25 }
 0x124   :  { %v287_v27 = vsub.f32 %v266_v24, %v286_v43 }
 0x126   :  { %v289_v28 = vmul.f32 %v288_v44, %v287_v27 }
 0x128   :  { %v290_v31 = vsub.f32 1.0, %v289_v28  ;;  %v294_v46 = vmul.f32 %v293_v30, %v289_v28 }
 0x12a   :  { %v292_v45 = vmul.f32 %v291_v29, %v290_v31 }
 0x12c   :  { %v295_v47 = vadd.f32 %v294_v46, %v292_v45 }
 0x12e   :  { %297 = vst.msk [vmem:[%s573_s3] sm:$0xff] %vm296_vm5, %v295_v47 }
 0x12f   :  { %302 = vsyncpa [#allocation3], 1 }
 0x130   :  { %303 = vsyncpa [#allocation4], 1 }

</bundles_post_ra>
